<compile_context>
chip_gen: v5e
topology: v5e:2x2
jax: 0.10.0
libtpu: 0.0.40
codegen_flags: <defaults>
</compile_context>

<pallas_src>
import functools

import jax
import jax.numpy as jnp
from jax import lax
from jax.experimental import pallas as pl
from jax.experimental.pallas import tpu as pltpu


def _one_v_rest_kernel(x_ref, sgn_ref, w_ref, r_ref,
                       out_ref, loss_ref, gsel_ref, xsq_ref, *, batch_size):
    x = x_ref[...]                                   # (TB, E) f32
    tb = x.shape[0]
    c = out_ref.shape[-1]                            # true class count (unpadded)
    cp = w_ref.shape[-1] // 3                        # lane-dense section width (mult of 128)

    # One fused MXU matmul.  W columns are [dW | C0 | C1] (each cp wide) and the bias
    # row r is [dB | -0.5||c0||^2 | -0.5||c1||^2], so after the broadcast add:
    #   z[:, 0:cp]     = delta = x @ (w1 - w0) + (b1 - b0)
    #   z[:, cp:2cp]   = x.c0 - 0.5||c0||^2
    #   z[:, 2cp:3cp]  = x.c1 - 0.5||c1||^2
    z = jnp.dot(x, w_ref[...], preferred_element_type=jnp.float32) + r_ref[...]

    delta = z[:, :c]
    g0 = z[:, cp:cp + c]
    g1 = z[:, 2 * cp:2 * cp + c]

    # 1-vs-rest score (HBM output is unpadded width C; padded rows sliced off outside).
    out_ref[...] = delta.astype(out_ref.dtype)

    # Binary-target predicate straight from the int8 sign stream (no float y built).
    p = sgn_ref[...].astype(jnp.int32) > 0           # (TB, C) bool

    # Row-validity mask generated in-kernel (no streamed mask array, B is static).
    row = lax.broadcasted_iota(jnp.int32, (tb, 1), 0) + pl.program_id(0) * tb
    rmask = (row < batch_size).astype(jnp.float32)   # (TB, 1)

    # 2-way cross-entropy collapses to softplus(+/- delta); numerically stable form.
    zd = jnp.where(p, -delta, delta)
    ce = jnp.maximum(zd, 0.0) + jnp.log1p(jnp.exp(-jnp.abs(zd)))

    # Batch-axis-only (lane-wise) partial sums; cross-lane reduce happens in the wrapper.
    loss_ref[...] = jnp.sum(ce * rmask, axis=0, keepdims=True).reshape(loss_ref.shape)

    g_sel = jnp.where(p, g1, g0)
    gsel_ref[...] = jnp.sum(g_sel * rmask, axis=0, keepdims=True).reshape(gsel_ref.shape)

    # ||x - c_y||^2 handled algebraically: sum_{valid b, i} (||x_b||^2 - 2 g_sel)
    #   = C * sum_valid ||x_b||^2 - 2 * sum g_sel  -> only a (1, E) partial needed here.
    xsq_ref[...] = jnp.sum(x * x * rmask, axis=0, keepdims=True).reshape(xsq_ref.shape)


def _round_up(n, m):
    return ((n + m - 1) // m) * m


def to_1vrest_center_forward(x, labels, params, *, max_tile_rows=1024,
                             out_dtype=jnp.float32,
                             vmem_limit_bytes=64 * 1024 * 1024):
    """x: (B, E) f32, labels: (B, C) f32 (sign carries the binary target)."""
    B, E = x.shape
    C = labels.shape[1]
    w0, w1, b0, b1, c0, c1 = params
    f32 = jnp.float32

    ROW_ALIGN = 32                                   # int8 label sublane packing
    Cp = max(128, _round_up(C, 128))                 # lane-dense matmul section width

    B_al = _round_up(B, ROW_ALIGN)
    TB = min(max_tile_rows, B_al)
    # v7x has 2 TensorCores: keep >= 2 grid blocks whenever the batch can be split,
    # so the "parallel" batch axis actually shards across both cores.
    if B_al // TB < 2 and TB >= 2 * ROW_ALIGN:
        TB = _round_up(TB // 2, ROW_ALIGN)
    Bp = _round_up(B, TB)
    nb = Bp // TB

    # ----- host-side, loop-invariant algebra (done once) -----
    def pad_cols(a, cols):
        a = a.astype(f32)
        extra = cols - a.shape[1]
        return a if extra == 0 else jnp.pad(a, ((0, 0), (0, extra)))

    dw = pad_cols(w1 - w0, Cp)                                   # (E, Cp)
    db = pad_cols(b1 - b0, Cp)                                   # (1, Cp)
    c0p = pad_cols(c0, Cp)
    c1p = pad_cols(c1, Cp)
    cn0 = jnp.sum(c0p * c0p, axis=0, keepdims=True)
    cn1 = jnp.sum(c1p * c1p, axis=0, keepdims=True)
    W = jnp.concatenate([dw, c0p, c1p], axis=1)                  # (E, 3*Cp)
    R = jnp.concatenate([db, -0.5 * cn0, -0.5 * cn1], axis=1)    # (1, 3*Cp)

    def pad_rows(a, rows):
        extra = rows - a.shape[0]
        return a if extra == 0 else jnp.pad(a, ((0, extra), (0, 0)))

    x_p = pad_rows(x.astype(f32), Bp)                            # (Bp, E) f32
    # Labels compressed to an int8 sign stream (4x less HBM traffic than f32 labels);
    # padded rows get 0 and are masked in-kernel.
    sgn_p = pad_rows((labels >= 0.0).astype(jnp.int8), Bp)       # (Bp, C) int8

    kernel = functools.partial(_one_v_rest_kernel, batch_size=B)

    out_full, loss_parts, gsel_parts, xsq_parts = pl.pallas_call(
        kernel,
        out_shape=(
            jax.ShapeDtypeStruct((Bp, C), out_dtype),    # 1-vs-rest scores (unpadded C)
            jax.ShapeDtypeStruct((nb, 1, C), f32),       # per-block CE partial sums
            jax.ShapeDtypeStruct((nb, 1, C), f32),       # per-block selected-center sums
            jax.ShapeDtypeStruct((nb, 1, E), f32),       # per-block sum of x^2 (valid rows)
        ),
        grid=(nb,),
        in_specs=[
            pl.BlockSpec((TB, E), lambda i: (i, 0)),         # x tile (pipelined)
            pl.BlockSpec((TB, C), lambda i: (i, 0)),         # int8 sign tile
            pl.BlockSpec((E, 3 * Cp), lambda i: (0, 0)),     # fused weights (VMEM-resident)
            pl.BlockSpec((1, 3 * Cp), lambda i: (0, 0)),     # fused bias row (resident)
        ],
        out_specs=(
            pl.BlockSpec((TB, C), lambda i: (i, 0)),
            pl.BlockSpec((1, 1, C), lambda i: (i, 0, 0)),
            pl.BlockSpec((1, 1, C), lambda i: (i, 0, 0)),
            pl.BlockSpec((1, 1, E), lambda i: (i, 0, 0)),
        ),
        compiler_params=pltpu.CompilerParams(
            dimension_semantics=("parallel",),               # batch blocks are independent
            vmem_limit_bytes=vmem_limit_bytes,
        ),
    )(x_p, sgn_p, W, R)

    inv_bc = 1.0 / (B * C)
    loss_mean = jnp.sum(loss_parts) * inv_bc
    creg_mean = 0.5 * (C * jnp.sum(xsq_parts) - 2.0 * jnp.sum(gsel_parts)) * inv_bc
    outputs = out_full[:B]
    return outputs, loss_mean, creg_mean


def _reference(x, labels, params):
    """Pure-JAX reference of the same forward pass (for sanity checking)."""
    w0, w1, b0, b1, c0, c1 = params
    y = jnp.where(labels >= 0.0, 1.0, 0.0)
    l0 = x @ w0 + b0
    l1 = x @ w1 + b1
    outputs = l1 - l0
    m = jnp.maximum(l0, l1)
    lse = m + jnp.log(jnp.exp(l0 - m) + jnp.exp(l1 - m))
    ce = lse - (y * l1 + (1.0 - y) * l0)
    loss = jnp.mean(ce)
    xn = jnp.sum(x * x, axis=-1, keepdims=True)
    d0 = xn - 2.0 * (x @ c0) + jnp.sum(c0 * c0, axis=0, keepdims=True)
    d1 = xn - 2.0 * (x @ c1) + jnp.sum(c1 * c1, axis=0, keepdims=True)
    creg = 0.5 * jnp.mean(y * d1 + (1.0 - y) * d0)
    return outputs, loss, creg


if __name__ == "__main__":
    B, E, C = 8, 32, 4   # batch, embed_size, num_classes

    key = jax.random.PRNGKey(0)
    kx, kl, kw0, kw1, kb0, kb1, kc0, kc1 = jax.random.split(key, 8)

    x = jax.random.normal(kx, (B, E), dtype=jnp.float32)
    # labels: signed floats; sign >= 0 -> target 1 (matches np.where(labels>=0,1,0))
    labels = jax.random.normal(kl, (B, C), dtype=jnp.float32)

    # deterministic synthetic parameters (Linear-style scale 1/sqrt(E))
    scale = 1.0 / jnp.sqrt(jnp.float32(E))
    w0 = jax.random.uniform(kw0, (E, C), jnp.float32, -scale, scale)
    w1 = jax.random.uniform(kw1, (E, C), jnp.float32, -scale, scale)
    b0 = jax.random.uniform(kb0, (1, C), jnp.float32, -scale, scale)
    b1 = jax.random.uniform(kb1, (1, C), jnp.float32, -scale, scale)
    c0 = jax.random.normal(kc0, (E, C), dtype=jnp.float32)   # label-0 centers
    c1 = jax.random.normal(kc1, (E, C), dtype=jnp.float32)   # label-1 centers
    params = (w0, w1, b0, b1, c0, c1)

    outputs, loss_mean, creg_mean = jax.block_until_ready(
        to_1vrest_center_forward(x, labels, params))

    ref_out, ref_loss, ref_creg = _reference(x, labels, params)
    assert jnp.allclose(outputs, ref_out, atol=1e-4, rtol=1e-4)
    assert jnp.allclose(loss_mean, ref_loss, atol=1e-4, rtol=1e-4)
    assert jnp.allclose(creg_mean, ref_creg, atol=1e-4, rtol=1e-4)

    print("KERNEL_OK")
</pallas_src>

<mosaic_0001>
module attributes {stable_mosaic.version = 11 : i64} {
  func.func @_one_v_rest_kernel(%arg0: i32, %arg1: memref<32x32xf32, #tpu.memory_space<vmem>>, %arg2: memref<32x4xi8, #tpu.memory_space<vmem>>, %arg3: memref<32x384xf32, #tpu.memory_space<vmem>>, %arg4: memref<1x384xf32, #tpu.memory_space<vmem>>, %arg5: memref<32x4xf32, #tpu.memory_space<vmem>>, %arg6: memref<1x1x4xf32, #tpu.memory_space<vmem>>, %arg7: memref<1x1x4xf32, #tpu.memory_space<vmem>>, %arg8: memref<1x1x32xf32, #tpu.memory_space<vmem>>) attributes {dimension_semantics = [#tpu.dimension_semantics<parallel>], iteration_bounds = array<i64: 1>, scalar_prefetch = 0 : i64, scratch_operands = 0 : i64, tpu.core_type = #tpu.core_type<tc>, window_params = [{transform_indices = @transform_0, window_bounds = array<i64: 32, 32>}, {transform_indices = @transform_1, window_bounds = array<i64: 32, 4>}, {pipeline_mode = #tpu.pipeline_mode<synchronous>, transform_indices = @transform_2, window_bounds = array<i64: 32, 384>}, {pipeline_mode = #tpu.pipeline_mode<synchronous>, transform_indices = @transform_3, window_bounds = array<i64: 1, 384>}, {transform_indices = @transform_4, window_bounds = array<i64: 32, 4>}, {transform_indices = @transform_5, window_bounds = array<i64: 1, 1, 4>}, {transform_indices = @transform_6, window_bounds = array<i64: 1, 1, 4>}, {transform_indices = @transform_7, window_bounds = array<i64: 1, 1, 32>}]} {
    %c0 = arith.constant 0 : index
    %c0_0 = arith.constant 0 : index
    %0 = vector.load %arg1[%c0, %c0_0] : memref<32x32xf32, #tpu.memory_space<vmem>>, vector<32x32xf32>
    %c0_1 = arith.constant 0 : index
    %c0_2 = arith.constant 0 : index
    %1 = vector.load %arg3[%c0_1, %c0_2] : memref<32x384xf32, #tpu.memory_space<vmem>>, vector<32x384xf32>
    %cst = arith.constant dense<0.000000e+00> : vector<32x384xf32>
    %2 = tpu.matmul %0, %1, %cst {dimension_numbers = #tpu.dot_dimension_numbers<[1], [0], [0], [1], [0, 0, 1, 1], [], []>} : vector<32x32xf32>, vector<32x384xf32>, vector<32x384xf32> -> vector<32x384xf32>
    %c0_3 = arith.constant 0 : index
    %c0_4 = arith.constant 0 : index
    %3 = vector.load %arg4[%c0_3, %c0_4] : memref<1x384xf32, #tpu.memory_space<vmem>>, vector<1x384xf32>
    %4 = vector.broadcast %3 : vector<1x384xf32> to vector<32x384xf32>
    %5 = arith.addf %2, %4 : vector<32x384xf32>
    %6 = vector.extract_strided_slice %5 {offsets = [0, 0], sizes = [32, 4], strides = [1, 1]} : vector<32x384xf32> to vector<32x4xf32>
    %7 = vector.extract_strided_slice %5 {offsets = [0, 128], sizes = [32, 4], strides = [1, 1]} : vector<32x384xf32> to vector<32x4xf32>
    %8 = vector.extract_strided_slice %5 {offsets = [0, 256], sizes = [32, 4], strides = [1, 1]} : vector<32x384xf32> to vector<32x4xf32>
    %c0_5 = arith.constant 0 : index
    %c0_6 = arith.constant 0 : index
    %9 = vector.load %arg5[%c0_5, %c0_6] : memref<32x4xf32, #tpu.memory_space<vmem>>, vector<32x4xf32>
    tpu.vector_store %arg5[%c0_5, %c0_6], %6 {strides = array<i32>} : memref<32x4xf32, #tpu.memory_space<vmem>>, vector<32x4xf32>,
    %c0_7 = arith.constant 0 : index
    %c0_8 = arith.constant 0 : index
    %10 = vector.load %arg2[%c0_7, %c0_8] : memref<32x4xi8, #tpu.memory_space<vmem>>, vector<32x4xi8>
    %11 = arith.extsi %10 : vector<32x4xi8> to vector<32x4xi32>
    %c0_i32 = arith.constant 0 : i32
    %12 = vector.broadcast %c0_i32 : i32 to vector<32x4xi32>
    %13 = arith.cmpi sgt, %11, %12 : vector<32x4xi32>
    %14 = tpu.iota {dimensions = array<i32: 0>} : vector<32x1xi32>
    %c32_i32 = arith.constant 32 : i32
    %15 = arith.muli %arg0, %c32_i32 : i32
    %16 = vector.broadcast %15 : i32 to vector<32x1xi32>
    %17 = arith.addi %14, %16 : vector<32x1xi32>
    %c8_i32 = arith.constant 8 : i32
    %18 = vector.broadcast %c8_i32 : i32 to vector<32x1xi32>
    %19 = arith.cmpi slt, %17, %18 : vector<32x1xi32>
    %20 = arith.extui %19 : vector<32x1xi1> to vector<32x1xi32>
    %21 = arith.sitofp %20 : vector<32x1xi32> to vector<32x1xf32>
    %cst_9 = arith.constant 0.000000e+00 : f32
    %22 = vector.broadcast %cst_9 : f32 to vector<32x4xf32>
    %23 = arith.subf %22, %6 : vector<32x4xf32>
    %24 = arith.select %13, %23, %6 : vector<32x4xi1>, vector<32x4xf32>
    %cst_10 = arith.constant 0.000000e+00 : f32
    %25 = vector.broadcast %cst_10 : f32 to vector<32x4xf32>
    %26 = arith.maximumf %24, %25 : vector<32x4xf32>
    %27 = math.absf %24 : vector<32x4xf32>
    %cst_11 = arith.constant 0.000000e+00 : f32
    %28 = vector.broadcast %cst_11 : f32 to vector<32x4xf32>
    %29 = arith.subf %28, %27 : vector<32x4xf32>
    %30 = math.exp %29 : vector<32x4xf32>
    %31 = math.log1p %30 : vector<32x4xf32>
    %32 = arith.addf %26, %31 : vector<32x4xf32>
    %33 = vector.broadcast %21 : vector<32x1xf32> to vector<32x4xf32>
    %34 = arith.mulf %32, %33 : vector<32x4xf32>
    %cst_12 = arith.constant dense<0.000000e+00> : vector<4xf32>
    %35 = vector.multi_reduction <add>, %34, %cst_12 [0] : vector<32x4xf32> to vector<4xf32>
    %36 = vector.shape_cast %35 : vector<4xf32> to vector<1x4xf32>
    %37 = vector.shape_cast %36 : vector<1x4xf32> to vector<1x1x4xf32>
    %c0_13 = arith.constant 0 : index
    %c0_14 = arith.constant 0 : index
    %c0_15 = arith.constant 0 : index
    %38 = vector.load %arg6[%c0_13, %c0_14, %c0_15] : memref<1x1x4xf32, #tpu.memory_space<vmem>>, vector<1x1x4xf32>
    tpu.vector_store %arg6[%c0_13, %c0_14, %c0_15], %37 {strides = array<i32>} : memref<1x1x4xf32, #tpu.memory_space<vmem>>, vector<1x1x4xf32>,
    %39 = arith.select %13, %8, %7 : vector<32x4xi1>, vector<32x4xf32>
    %40 = vector.broadcast %21 : vector<32x1xf32> to vector<32x4xf32>
    %41 = arith.mulf %39, %40 : vector<32x4xf32>
    %cst_16 = arith.constant dense<0.000000e+00> : vector<4xf32>
    %42 = vector.multi_reduction <add>, %41, %cst_16 [0] : vector<32x4xf32> to vector<4xf32>
    %43 = vector.shape_cast %42 : vector<4xf32> to vector<1x4xf32>
    %44 = vector.shape_cast %43 : vector<1x4xf32> to vector<1x1x4xf32>
    %c0_17 = arith.constant 0 : index
    %c0_18 = arith.constant 0 : index
    %c0_19 = arith.constant 0 : index
    %45 = vector.load %arg7[%c0_17, %c0_18, %c0_19] : memref<1x1x4xf32, #tpu.memory_space<vmem>>, vector<1x1x4xf32>
    tpu.vector_store %arg7[%c0_17, %c0_18, %c0_19], %44 {strides = array<i32>} : memref<1x1x4xf32, #tpu.memory_space<vmem>>, vector<1x1x4xf32>,
    %46 = arith.mulf %0, %0 : vector<32x32xf32>
    %47 = vector.broadcast %21 : vector<32x1xf32> to vector<32x32xf32>
    %48 = arith.mulf %46, %47 : vector<32x32xf32>
    %cst_20 = arith.constant dense<0.000000e+00> : vector<32xf32>
    %49 = vector.multi_reduction <add>, %48, %cst_20 [0] : vector<32x32xf32> to vector<32xf32>
    %50 = vector.shape_cast %49 : vector<32xf32> to vector<1x32xf32>
    %51 = vector.shape_cast %50 : vector<1x32xf32> to vector<1x1x32xf32>
    %c0_21 = arith.constant 0 : index
    %c0_22 = arith.constant 0 : index
    %c0_23 = arith.constant 0 : index
    %52 = vector.load %arg8[%c0_21, %c0_22, %c0_23] : memref<1x1x32xf32, #tpu.memory_space<vmem>>, vector<1x1x32xf32>
    tpu.vector_store %arg8[%c0_21, %c0_22, %c0_23], %51 {strides = array<i32>} : memref<1x1x32xf32, #tpu.memory_space<vmem>>, vector<1x1x32xf32>,
    return
  }
  func.func @transform_0(%arg0: i32) -> (i32, i32) {
    %c0_i32 = arith.constant 0 : i32
    %c0_i32_0 = arith.constant 0 : i32
    return %arg0, %c0_i32 : i32, i32
  }
  func.func @transform_1(%arg0: i32) -> (i32, i32) {
    %c0_i32 = arith.constant 0 : i32
    %c0_i32_0 = arith.constant 0 : i32
    return %arg0, %c0_i32 : i32, i32
  }
  func.func @transform_2(%arg0: i32) -> (i32, i32) {
    %c0_i32 = arith.constant 0 : i32
    %c0_i32_0 = arith.constant 0 : i32
    %c0_i32_1 = arith.constant 0 : i32
    return %c0_i32, %c0_i32_0 : i32, i32
  }
  func.func @transform_3(%arg0: i32) -> (i32, i32) {
    %c0_i32 = arith.constant 0 : i32
    %c0_i32_0 = arith.constant 0 : i32
    %c0_i32_1 = arith.constant 0 : i32
    return %c0_i32, %c0_i32_0 : i32, i32
  }
  func.func @transform_4(%arg0: i32) -> (i32, i32) {
    %c0_i32 = arith.constant 0 : i32
    %c0_i32_0 = arith.constant 0 : i32
    return %arg0, %c0_i32 : i32, i32
  }
  func.func @transform_5(%arg0: i32) -> (i32, i32, i32) {
    %c0_i32 = arith.constant 0 : i32
    %c0_i32_0 = arith.constant 0 : i32
    %c0_i32_1 = arith.constant 0 : i32
    return %arg0, %c0_i32, %c0_i32_0 : i32, i32, i32
  }
  func.func @transform_6(%arg0: i32) -> (i32, i32, i32) {
    %c0_i32 = arith.constant 0 : i32
    %c0_i32_0 = arith.constant 0 : i32
    %c0_i32_1 = arith.constant 0 : i32
    return %arg0, %c0_i32, %c0_i32_0 : i32, i32, i32
  }
  func.func @transform_7(%arg0: i32) -> (i32, i32, i32) {
    %c0_i32 = arith.constant 0 : i32
    %c0_i32_0 = arith.constant 0 : i32
    %c0_i32_1 = arith.constant 0 : i32
    return %arg0, %c0_i32, %c0_i32_0 : i32, i32, i32
  }
}

</mosaic_0001>

<bundles_post_ra>
// kernel: tpu_custom_call.1
= control target key start
LH: loop header
LB: loop body
LE: loop exit
PB: predicated region body
PF: predicated region fallthrough
CT: control target
= control target key end

     0   :  { %13 = vsyncpa [#allocation3], 0  ;;  %s766_s0 = inlined_call_operand.hbm [shape: f32[32,32], index: 0, kind: input, shape index: {}]   ;;  %s767_s1 = inlined_call_operand.vmem [shape: s8[32,4], index: 1, kind: input, shape index: {}]   ;;  %s768_s2 = inlined_call_operand.hbm [shape: f32[32,384], index: 2, kind: input, shape index: {}]   ;;  %s769_s3 = inlined_call_operand.vmem [shape: f32[1,384], index: 3, kind: input, shape index: {}]   ;;  %s770_s4 = inlined_call_operand.vmem [shape: f32[32,4], index: 4, kind: output, shape index: {0}]   ;;  %s771_s5 = inlined_call_operand.hbm [shape: f32[1,1,4], index: 5, kind: output, shape index: {1}]   ;;  %s772_s6 = inlined_call_operand.hbm [shape: f32[1,1,4], index: 6, kind: output, shape index: {2}]   ;;  %s773_s7 = inlined_call_operand.hbm [shape: f32[1,1,32], index: 7, kind: output, shape index: {3}]  }
   0x1   :  { %14 = vsyncpa [#allocation6], 0 }
   0x2   :  { %15 = vsyncpa [#allocation4], 0 }
   0x3   :  { %16 = vsyncpa [#allocation9], 0  ;;  %s21_s26 = sshll.u32 %s766_s0, 4  ;;  %s590_s27 = smov [#allocation2]   ;;  %s22_s26 = int_to_ptr.hbm [resolvable:$true] %s21_s26 }
   0x4   :  { %s23_s28 = sshll.u32 %s590_s27, 4  ;;  %s36_s8 = sshll.u32 %s768_s2, 4  ;;  %s24_s28 = int_to_ptr.vmem [resolvable:$true] %s23_s28  ;;  %s37_s8 = int_to_ptr.hbm [resolvable:$true] %s36_s8 }
   0x5   :  { %s591_s9 = smov 128   ;;  %s592_s10 = smov 8  }
   0x6   :  { %29 = dma.hbm_to_vmem [thread:$0]  %s22_s26, 512, %s24_s28, [#allocation3], %s591_s9, %s591_s9, %s592_s10  }
   0x7   :  { %s593_s11 = smov [#allocation5]   ;;  %s594_s13 = smov 384  }
   0x8   :  { %s38_s12 = sshll.u32 %s593_s11, 4  ;;  %s595_s14 = smov 24   ;;  %s39_s12 = int_to_ptr.vmem [resolvable:$true] %s38_s12 }
   0x9   :  { %44 = dma.hbm_to_vmem [thread:$0]  %s37_s8, 1536, %s39_s12, [#allocation6], %s594_s13, %s594_s13, %s595_s14  }
   0xa   :  { %582 = dma.done.wait [#allocation3], 512  }
   0xb   :  { %583 = vsyncadd [#allocation3], 4294966784 }
   0xc   :  { %584 = dma.done.wait [#allocation6], 1536  }
   0xd   :  { %585 = vsyncadd [#allocation6], 4294965760  ;;  %v68_v0 = vld [vmem:[#allocation5 + $0x48] sm:$0xff]  ;;  %v65_v1 = vld [vmem:[#allocation5 + $0x30] sm:$0xff]  ;;  %vm79_vm0 = vcmask 261120   ;;  %vm179_vm1 = vcmask 31744  }
   0xe   :  { %104 = vmatpush.msra.mxu0 %v68_v0  ;;  %424 = vmatpush.msra.mxu3 %v68_v0  ;;  %v55_v2 = vld [vmem:[#allocation2] sm:$0xff]  ;;  %v56_v3 = vld [vmem:[#allocation2 + $0x8] sm:$0xff]  ;;  %v62_v4 = vld [vmem:[#allocation5 + $0x18] sm:$0xff]  ;;  %vm349_vm7 = vcmask 253952   ;;  %s371_s26 = sshll.u32 %s772_s6, 4  ;;  %s597_s27 = smov [#allocation10]   ;;  %s372_s26 = int_to_ptr.hbm [resolvable:$true] %s371_s26 }
   0xf   :  { %v328_v5 = vmul.f32 %v55_v2, %v55_v2  ;;  %v329_v6 = vmul.f32 %v56_v3, %v56_v3  ;;  %v70_v7 = vld [vmem:[#allocation5 + $0x58] sm:$0xff]  ;;  %v67_v8 = vld [vmem:[#allocation5 + $0x40] sm:$0xff]  ;;  %v57_v9 = vld [vmem:[#allocation2 + $0x10] sm:$0xff]  ;;  %s380_s28 = sshll.u32 %s597_s27, 4  ;;  %s382_s8 = sshll.u32 %s773_s7, 4  ;;  %vm304_vm10 = vcmask 24576   ;;  %s381_s28 = int_to_ptr.vmem [resolvable:$true] %s380_s28  ;;  %s383_s8 = int_to_ptr.hbm [resolvable:$true] %s382_s8 }
  0x10   :  { %105 = vmatpush.msra.mxu0 %v65_v1  ;;  %425 = vmatpush.msra.mxu3 %v65_v1  ;;  %v69_v10 = vld [vmem:[#allocation5 + $0x50] sm:$0xff]  ;;  %v59_v11 = vld [vmem:[#allocation5] sm:$0xff]  ;;  %v330_v14 = vmul.f32 %v57_v9, %v57_v9  ;;  %v66_v15 = vld [vmem:[#allocation5 + $0x38] sm:$0xff]  ;;  %s598_s6 = smov [#allocation7]   ;;  %s360_s11 = sshll.u32 %s771_s5, 4  ;;  %s361_s11 = int_to_ptr.hbm [resolvable:$true] %s360_s11 }
  0x11   :  { %v336_v12 = vsel %vm79_vm0, %v328_v5, 0.0  ;;  %v333_v13 = vmul.f32 0.0, %v329_v6  ;;  %432 = vmatpush.msra.mxu2 %v70_v7  ;;  %428 = vmatpush.msra.mxu1 %v69_v10  ;;  %v58_v16 = vld [vmem:[#allocation2 + $0x18] sm:$0xff]  ;;  %v64_v18 = vld [vmem:[#allocation5 + $0x28] sm:$0xff]  ;;  %v63_v20 = vld [vmem:[#allocation5 + $0x20] sm:$0xff]  ;;  %s358_s7 = sshll.u32 %s598_s6, 4  ;;  %s359_s7 = int_to_ptr.vmem [resolvable:$true] %s358_s7 }
  0x12   :  { %106 = vmatpush.msra.mxu0 %v62_v4  ;;  %426 = vmatpush.msra.mxu3 %v62_v4  ;;  %v334_v19 = vmul.f32 0.0, %v330_v14  ;;  %v331_v21 = vmul.f32 %v58_v16, %v58_v16  ;;  %v61_v24 = vld [vmem:[#allocation5 + $0x10] sm:$0xff]  ;;  %v60_v25 = vld [vmem:[#allocation5 + $0x8] sm:$0xff]  ;;  %v71_v30 = vld [vmem:[%s769_s3] sm:$0x7] }
  0x13   :  { %v337_v17 = vsel %vm79_vm0, %v333_v13, 0.0  ;;  %433 = vmatpush.msra.mxu2 %v67_v8  ;;  %429 = vmatpush.msra.mxu1 %v66_v15  ;;  %v417_v31 = vld [vmem:[%s767_s1] sm:$0xff]   ;;  %v73_v32 = vperm.slane %v71_v30, 0  ;;  %v74_v46 = vperm.slane %v71_v30, 1  ;;  %v75_v47 = vperm.slane %v71_v30, 2 }
  0x14   :  { %107 = vmatpush.msra.mxu0 %v59_v11  ;;  %427 = vmatpush.msra.mxu3 %v59_v11  ;;  %v338_v22 = vadd.f32 %v337_v17, %v336_v12  ;;  %v339_v23 = vsel %vm79_vm0, %v334_v19, 0.0  ;;  %v335_v26 = vmul.f32 0.0, %v331_v21  ;;  %v418_v33 = vunpack.c.0.s8 %v417_v31 }
  0x15   :  { %404 = vmatmul.msk.f32.vlgmr.msra.gmra.mxu0 %vm79_vm0, %v55_v2  ;;  %405 = vmatmul.msk.f32.vlgmr.msra.gmra.mxu3 %vm79_vm0, %v56_v3  ;;  %v419_v38 = vunpack.c.1.s8 %v417_v31  ;;  %v422_v53 = vunpack.c.2.s8 %v417_v31  ;;  %v423_v6 = vunpack.c.3.s8 %v417_v31 }
  0x16   :  { %434 = vmatpush.msra.mxu2 %v64_v18  ;;  %v340_v27 = vadd.f32 %v339_v23, %v338_v22  ;;  %430 = vmatpush.msra.mxu1 %v63_v20  ;;  %v341_v28 = vsel %vm79_vm0, %v335_v26, 0.0  ;;  %vm669_vm2 = vcmp.gt.s32.totalorder %v418_v33, 0 }
  0x17   :  { %133 = vmatpush.msrb.mxu0 %v69_v10  ;;  %vm682_vm3 = vcmp.gt.s32.totalorder %v419_v38, 0  ;;  %vm695_vm4 = vcmp.gt.s32.totalorder %v422_v53, 0  ;;  %vm715_vm5 = vcmp.gt.s32.totalorder %v423_v6, 0 }
  0x18   :  { %435 = vmatpush.msra.mxu2 %v61_v24  ;;  %431 = vmatpush.msra.mxu1 %v60_v25  ;;  %v651_v29 = vadd.f32 %v341_v28, %v340_v27 }
  0x19   :  { %413 = vmatmul.msk.f32.vlgmr.msra.gmra.mxu2 %vm79_vm0, %v56_v3  ;;  %409 = vmatmul.msk.f32.vlgmr.msra.gmra.mxu1 %vm79_vm0, %v56_v3 }
  0x1a   :  { %134 = vmatpush.msrb.mxu0 %v66_v15  ;;  %v343_v15 = vrot.slane %v651_v29, 4 }
  0x1c   :  { %135 = vmatpush.msrb.mxu0 %v63_v20 }
  0x1d   :  { %406 = vmatmul.msk.f32.gmra.mxu3 %vm79_vm0, %v57_v9 }
  0x1e   :  { %136 = vmatpush.msrb.mxu0 %v60_v25 }
  0x1f   :  { %408 = vmatmul.msk.f32.vlgmr.msrb.gmra.mxu0 %vm79_vm0, %v55_v2 }
  0x20   :  { %162 = vmatpush.msra.mxu0 %v70_v7 }
  0x21   :  { %414 = vmatmul.msk.f32.gmra.mxu2 %vm79_vm0, %v57_v9  ;;  %410 = vmatmul.msk.f32.gmra.mxu1 %vm79_vm0, %v57_v9 }
  0x22   :  { %163 = vmatpush.msra.mxu0 %v67_v8 }
  0x24   :  { %164 = vmatpush.msra.mxu0 %v64_v18 }
  0x25   :  { %407 = vmatmul.msk.f32.gmra.mxu3 %vm79_vm0, %v58_v16 }
  0x26   :  { %165 = vmatpush.msra.mxu0 %v61_v24 }
  0x27   :  { %412 = vmatmul.msk.f32.vlgmr.msra.gmra.mxu0 %vm79_vm0, %v55_v2 }
  0x29   :  { %415 = vmatmul.msk.f32.gmra.mxu2 %vm79_vm0, %v58_v16  ;;  %411 = vmatmul.msk.f32.gmra.mxu1 %vm79_vm0, %v58_v16 }
  0x92   :  { %v109_v34 = vpop.f32.mrf.mxu0 }
  0x93   :  { %v110_v35 = vadd.f32 %v109_v34, %v73_v32 }
  0x95   :  { %180 = vst.msk [vmem:[%s770_s4] sm:$0xff] %vm179_vm1, %v110_v35  ;;  %v219_v37 = vsub.f32 0.0, %v110_v35 }
  0x96   :  { %v141_v39 = vpop.f32.mrf.mxu1 }
  0x97   :  { %v679_v40 = vsel %vm669_vm2, %v219_v37, %v110_v35  ;;  %v142_v54 = vadd.f32 %v141_v39, %v74_v46 }
  0x98   :  { %v112_v41 = vpop.f32.mrf.mxu3  ;;  %v231_v42 = vand.u32 2147483647, %v679_v40 }
  0x99   :  { %v113_v43 = vadd.f32 %v112_v41, %v73_v32 }
  0x9a   :  { %v235_v50 = vsub.f32 0.0, %v231_v42 }
  0x9b   :  { %181 = vst.msk [vmem:[%s770_s4 + $0x8] sm:$0xff] %vm179_vm1, %v113_v43  ;;  %v220_v45 = vsub.f32 0.0, %v113_v43 }
  0x9c   :  { %v170_v48 = vpop.f32.mrf.mxu2  ;;  %v138_v49 = vpop.f32.mrf.mxu0  ;;  %v239_v59 = vmul.f32 1.442695, %v235_v50 }
  0x9d   :  { %v692_v51 = vsel %vm682_vm3, %v220_v45, %v113_v43  ;;  %v171_v55 = vadd.f32 %v170_v48, %v75_v47  ;;  %v139_v1 = vadd.f32 %v138_v49, %v74_v46 }
  0x9e   :  { %v232_v52 = vand.u32 2147483647, %v692_v51  ;;  %v144_v58 = vpop.f32.mrf.mxu1 }
  0x9f   :  { %v307_v0 = vsel %vm682_vm3, %v171_v55, %v142_v54  ;;  %v145_v2 = vadd.f32 %v144_v58, %v74_v46 }
  0xa0   :  { %v236_v56 = vsub.f32 0.0, %v232_v52  ;;  %v115_v57 = vpop.f32.mrf.mxu3  ;;  %v311_v8 = vmul.f32 0.0, %v307_v0 }
  0xa1   :  { %v116_v60 = vadd.f32 %v115_v57, %v73_v32 }
  0xa2   :  { %v241_v61 = vmul.f32 1.442695, %v236_v56  ;;  %v315_v20 = vsel %vm179_vm1, %v311_v8, 0.0 }
  0xa3   :  { %182 = vst.msk [vmem:[%s770_s4 + $0x10] sm:$0xff] %vm179_vm1, %v116_v60  ;;  %v221_v63 = vsub.f32 0.0, %v116_v60 }
  0xa4   :  { %446 = vpow2.f32 %v241_v61  ;;  %v173_v3 = vpop.f32.mrf.mxu2  ;;  %v167_v4 = vpop.f32.mrf.mxu0 }
  0xa5   :  { %448 = vpow2.f32 %v239_v59  ;;  %v707_v5 = vsel %vm695_vm4, %v221_v63, %v116_v60  ;;  %v174_v9 = vadd.f32 %v173_v3, %v75_v47  ;;  %v168_v10 = vadd.f32 %v167_v4, %v75_v47 }
  0xa6   :  { %v233_v7 = vand.u32 2147483647, %v707_v5  ;;  %v147_v23 = vpop.f32.mrf.mxu1  ;;  %v228_v4 = vmax.f32 %v692_v51, 0.0 }
  0xa7   :  { %v308_v13 = vsel %vm695_vm4, %v174_v9, %v145_v2  ;;  %v306_v14 = vsel %vm669_vm2, %v168_v10, %v139_v1  ;;  %v148_v31 = vadd.f32 %v147_v23, %v74_v46  ;;  %v229_v10 = vmax.f32 %v707_v5, 0.0 }
  0xa8   :  { %v237_v11 = vsub.f32 0.0, %v233_v7  ;;  %v118_v12 = vpop.f32.mrf.mxu3  ;;  %v312_v21 = vmul.f32 0.0, %v308_v13  ;;  %v314_v22 = vsel %vm179_vm1, %v306_v14, 0.0 }
  0xa9   :  { %v119_v16 = vadd.f32 %v118_v12, %v73_v32  ;;  %v316_v30 = vadd.f32 %v315_v20, %v314_v22  ;;  %v344_v32 = vadd.f32 %v343_v15, %v651_v29  ;;  %v227_v22 = vmax.f32 %v679_v40, 0.0 }
  0xaa   :  { %v447_v18 = vpop.eup %446  ;;  %v243_v19 = vmul.f32 1.442695, %v237_v11  ;;  %v317_v35 = vsel %vm179_vm1, %v312_v21, 0.0 }
  0xab   :  { %v449_v24 = vpop.eup %448  ;;  %v256_v25 = vadd.f32 1.0, %v447_v18  ;;  %183 = vst.msk [vmem:[%s770_s4 + $0x18] sm:$0xff] %vm179_vm1, %v119_v16  ;;  %v222_v26 = vsub.f32 0.0, %v119_v16  ;;  %v259_v36 = vmul.f32 -0.5, %v447_v18  ;;  %v318_v39 = vadd.f32 %v317_v35, %v316_v30  ;;  %s596_s4 = smov [#allocation8]  }
  0xac   :  { %450 = vpow2.f32 %v243_v19  ;;  %v176_v27 = vpop.f32.mrf.mxu2  ;;  %v247_v33 = vadd.f32 1.0, %v449_v24  ;;  %v345_v45 = vrot.slane %v344_v32, 2  ;;  %v250_v48 = vmul.f32 -0.5, %v449_v24  ;;  %s369_s23 = sshll.u32 %s596_s4, 4  ;;  %s370_s23 = int_to_ptr.vmem [resolvable:$true] %s369_s23 }
  0xad   :  { %452 = vlog2.f32 %v256_v25  ;;  %v727_v28 = vsel %vm715_vm5, %v222_v26, %v119_v16  ;;  %v177_v37 = vadd.f32 %v176_v27, %v75_v47  ;;  %v260_v29 = vadd.f32 1.0, %v259_v36 }
  0xae   :  { %v234_v34 = vand.u32 2147483647, %v727_v28  ;;  %454 = vlog2.f32 %v247_v33  ;;  %v346_v53 = vadd.f32 %v345_v45, %v344_v32  ;;  %v262_v47 = vand.u32 2147483647, %v447_v18 }
  0xaf   :  { %v309_v41 = vsel %vm715_vm5, %v177_v37, %v148_v31  ;;  %v251_v57 = vadd.f32 1.0, %v250_v48  ;;  %v253_v60 = vand.u32 2147483647, %v449_v24  ;;  %v261_v61 = vmul.f32 %v447_v18, %v260_v29 }
  0xb0   :  { %v238_v38 = vsub.f32 0.0, %v234_v34  ;;  %v313_v44 = vmul.f32 0.0, %v309_v41  ;;  %v347_v56 = vrot.slane %v346_v53, 1  ;;  %vm735_vm6 = vcmp.lt.f32.partialorder %v262_v47, 0.0004427343 }
  0xb1   :  { %v252_v9 = vmul.f32 %v449_v24, %v251_v57  ;;  %vm743_vm8 = vcmp.lt.f32.partialorder %v253_v60, 0.0004427343  ;;  %v230_v34 = vmax.f32 %v727_v28, 0.0 }
  0xb2   :  { %v451_v42 = vpop.eup %450  ;;  %v245_v43 = vmul.f32 1.442695, %v238_v38  ;;  %v319_v52 = vsel %vm179_vm1, %v313_v44, 0.0  ;;  %v348_v63 = vadd.f32 %v347_v56, %v346_v53 }
  0xb3   :  { %v453_v46 = vpop.eup %452  ;;  %v265_v49 = vadd.f32 1.0, %v451_v42  ;;  %v268_v50 = vmul.f32 -0.5, %v451_v42  ;;  %v320_v54 = vadd.f32 %v319_v52, %v318_v39  ;;  %v271_v1 = vand.u32 2147483647, %v451_v42 }
  0xb4   :  { %456 = vpow2.f32 %v245_v43  ;;  %v258_v55 = vmul.f32 0.6931472, %v453_v46  ;;  %v455_v59 = vpop.eup %454  ;;  %350 = vst.msk [vmem:[#allocation10] sm:$0x1] %vm349_vm7, %v348_v63 }
  0xb5   :  { %458 = vlog2.f32 %v265_v49  ;;  %v321_v58 = vrot.slane %v320_v54, 4  ;;  %v269_v62 = vadd.f32 1.0, %v268_v50  ;;  %v249_v8 = vmul.f32 0.6931472, %v455_v59 }
  0xb6   :  { %v264_v6 = vsel %vm735_vm6, %v261_v61, %v258_v55  ;;  %vm272_vm9 = vcmp.lt.f32.partialorder %v271_v1, 0.0004427343 }
  0xb7   :  { %v322_v2 = vadd.f32 %v321_v58, %v320_v54  ;;  %v270_v13 = vmul.f32 %v451_v42, %v269_v62  ;;  %v284_v17 = vadd.f32 %v264_v6, %v228_v4  ;;  %v255_v5 = vsel %vm743_vm8, %v252_v9, %v249_v8 }
  0xb8   :  { %v283_v27 = vadd.f32 %v255_v5, %v227_v22 }
  0xb9   :  { %v323_v15 = vrot.slane %v322_v2, 2  ;;  %v288_v23 = vmul.f32 0.0, %v284_v17 }
  0xba   :  { %v457_v3 = vpop.eup %456  ;;  %v291_v35 = vsel %vm179_vm1, %v283_v27, 0.0 }
  0xbb   :  { %v459_v7 = vpop.eup %458  ;;  %v274_v11 = vadd.f32 1.0, %v457_v3  ;;  %v277_v14 = vmul.f32 -0.5, %v457_v3  ;;  %v324_v18 = vadd.f32 %v323_v15, %v322_v2  ;;  %v280_v24 = vand.u32 2147483647, %v457_v3 }
  0xbc   :  { %v267_v12 = vmul.f32 0.6931472, %v459_v7  ;;  %v292_v33 = vsel %vm179_vm1, %v288_v23, 0.0 }
  0xbd   :  { %460 = vlog2.f32 %v274_v11  ;;  %v278_v20 = vadd.f32 1.0, %v277_v14  ;;  %v325_v21 = vrot.slane %v324_v18, 1  ;;  %vm281_vm11 = vcmp.lt.f32.partialorder %v280_v24, 0.0004427343 }
  0xbe   :  { %v273_v51 = vsel %vm272_vm9, %v270_v13, %v267_v12  ;;  %v293_v38 = vadd.f32 %v292_v33, %v291_v35 }
  0xbf   :  { %v285_v19 = vadd.f32 %v273_v51, %v229_v10  ;;  %v326_v25 = vadd.f32 %v325_v21, %v324_v18  ;;  %v279_v32 = vmul.f32 %v457_v3, %v278_v20 }
  0xc1   :  { %v289_v30 = vmul.f32 0.0, %v285_v19  ;;  %327 = vst.msk [vmem:[#allocation8] sm:$0x1] %vm304_vm10, %v326_v25 }
  0xc2   :  { %374 = dma.vmem_to_hbm [thread:$0]  %s370_s23, 16, %s372_s26, [#allocation9]  }
  0xc3   :  { %v461_v26 = vpop.eup %460  ;;  %385 = dma.vmem_to_hbm [thread:$0]  %s381_s28, 16, %s383_s8, [#allocation9]   ;;  %v294_v36 = vsel %vm179_vm1, %v289_v30, 0.0 }
  0xc4   :  { %v276_v31 = vmul.f32 0.6931472, %v461_v26  ;;  %v295_v41 = vadd.f32 %v294_v36, %v293_v38 }
  0xc6   :  { %v282_v40 = vsel %vm281_vm11, %v279_v32, %v276_v31 }
  0xc7   :  { %v286_v37 = vadd.f32 %v282_v40, %v230_v34 }
  0xc9   :  { %v290_v39 = vmul.f32 0.0, %v286_v37 }
  0xcb   :  { %v296_v42 = vsel %vm179_vm1, %v290_v39, 0.0 }
  0xcc   :  { %v297_v43 = vadd.f32 %v296_v42, %v295_v41 }
  0xce   :  { %v298_v44 = vrot.slane %v297_v43, 4 }
  0xd0   :  { %v299_v45 = vadd.f32 %v298_v44, %v297_v43 }
  0xd2   :  { %v300_v46 = vrot.slane %v299_v45, 2 }
  0xd4   :  { %v301_v48 = vadd.f32 %v300_v46, %v299_v45 }
  0xd6   :  { %v302_v28 = vrot.slane %v301_v48, 1 }
  0xd8   :  { %v303_v29 = vadd.f32 %v302_v28, %v301_v48 }
  0xda   :  { %305 = vst.msk [vmem:[#allocation7] sm:$0x1] %vm304_vm10, %v303_v29 }
  0xdb   :  { %363 = dma.vmem_to_hbm [thread:$0]  %s359_s7, 16, %s361_s11, [#allocation4]  }
  0xdc   :  { %586 = dma.done.wait [#allocation4], 16  }
  0xdd   :  { %587 = vsyncadd [#allocation4], 4294967280 }
  0xde   :  { %588 = dma.done.wait [#allocation9], 32  }
  0xdf   :  { %589 = vsyncadd [#allocation9], 4294967264 }
  0xe0   :  { %400 = vsyncpa [#allocation3], 1 }
  0xe1   :  { %401 = vsyncpa [#allocation6], 1 }
  0xe2   :  { %402 = vsyncpa [#allocation4], 1 }
  0xe3   :  { %403 = vsyncpa [#allocation9], 1 }

</bundles_post_ra>
